<compile_context>
chip_gen: v6e
topology: v6e:2x2x1
jax: 0.10.0
libtpu: 0.0.40
codegen_flags: <defaults>
</compile_context>

<pallas_src>
import jax
import jax.numpy as jnp
import numpy as np
from jax import lax
from jax.experimental import pallas as pl
from jax.experimental.pallas import tpu as pltpu


# ----------------------------- Pallas kernel --------------------------------


def make_fused_decoder_kernel(dims, n_units_out, nonlin_split,
                              w_offsets, b_offsets, wl_offset, bl_offset):
    """Fused GraphDecoderHomo forward: all GraphConv layers + MultiActivationHead.

    dims = [D0, D1, ..., D_{L-1}, 1] -- feature widths through the L GraphConv layers.
    The kernel works in the transposed "nodes-on-lanes" layout (features on sublanes) so
    the final Dout=1 layer and the activation head emit one lane-dense (1, N) row.
    """
    n_hidden = len(dims) - 2          # GraphConv layers before the final ->1 layer
    _nt = (((1,), (1,)), ((), ()))    # contract both minor dims:  X @ M.T, M untransposed

    def kernel(a_ref, dout_ref, din_ref, feat_ref, *rest):
        if n_hidden >= 1:
            w_ref, p_ref, o_ref = rest
        else:
            p_ref, o_ref = rest

        dout_row = dout_ref[...]                          # (1, N) f32, src-degree^-1/2
        din_row = din_ref[...]                            # (1, N) f32, dst-degree^-1/2

        if n_hidden >= 1:
            # Adjacency cast to bf16 once; stays resident across every hidden layer.
            a_bf = a_ref[...].astype(jnp.bfloat16)        # (N, N), A[dst, src]
            h_bf = feat_ref[...].astype(jnp.bfloat16)     # layer-0 input: z, natural (N, D0)
            h_f32 = None
            for li in range(n_hidden):
                d_in, d_out = dims[li], dims[li + 1]
                wo, bo = w_offsets[li], b_offsets[li]
                wt = w_ref[wo:wo + d_out, 0:d_in]         # (d_out, d_in) bf16  (= W.T)
                b_col = p_ref[bo:bo + d_out, :]           # (d_out, 1)    f32
                # GraphConv with in_feats >= out_feats: W applied BEFORE aggregation.
                if li == 0:
                    # z is in its natural layout: contract both minor dims (no transpose).
                    t = lax.dot_general(wt, h_bf, _nt,
                                        preferred_element_type=jnp.float32)    # (d_out, N)
                else:
                    t = jnp.dot(wt, h_bf, preferred_element_type=jnp.float32)  # (d_out, N)
                # Aggregation h <- A @ h with norm='both': degree scalings as cheap
                # (d_out, N) row multiplies, src axis of A contracted directly (NT matmul).
                t_bf = (t * dout_row).astype(jnp.bfloat16)
                agg = lax.dot_general(t_bf, a_bf, _nt,
                                      preferred_element_type=jnp.float32)      # (d_out, N)
                h_f32 = jnp.maximum(agg * din_row + b_col, 0.0)                # bias + relu
                h_bf = h_f32.astype(jnp.bfloat16)
        else:
            # decoder_l == 1: the single (final) layer consumes z at full f32 precision.
            h_f32 = feat_ref[...]                         # (D0, N) f32, pre-transposed

        # Final GraphConv layer (Dout == 1): VPU multiply + sublane (XLU) reduction instead
        # of a 1-column MXU matmul; the single-row aggregation stays in f32.
        d_last = dims[-2]
        w_last = p_ref[wl_offset:wl_offset + d_last, :]   # (d_last, 1) f32
        b_last = p_ref[bl_offset:bl_offset + 1, :]        # (1, 1)      f32
        u = jnp.sum(h_f32 * w_last, axis=0, keepdims=True)                     # (1, N) f32
        v = lax.dot_general(u * dout_row, a_ref[...], _nt,
                            preferred_element_type=jnp.float32)
        v = v * din_row + b_last                          # (1, N) f32, no nonlinearity

        # Fused MultiActivationHead: after reshape(b_size, n_units_out) the output column of
        # node n is n % n_units_out, so the activation is selectable on the lane index.
        col = lax.broadcasted_iota(jnp.int32, v.shape, 1) % n_units_out
        o_ref[...] = jnp.where(col < nonlin_split,
                               jnp.maximum(v, 0.0),
                               jax.nn.sigmoid(v)).astype(o_ref.dtype)

    return kernel


# ------------------------------ module wrapper ------------------------------


def _round_up(x, m):
    return (x + m - 1) // m * m


def graph_decoder_homo_forward(params, b_z, b_adj_weighted, out_deg_inv_sqrt,
                               in_deg_inv_sqrt, b_size, n_units_out, nonlin_split):
    """Mirrors GraphDecoderHomo.forward((b_z, b_adj, b_edge_weight), b_size).

    Everything (degree normalization, layout changes, bf16 casts, all GraphConv layers and
    the MultiActivationHead) runs inside ONE pallas_call; the wrapper only packs the small
    per-layer parameters into two contiguous slabs (a one-time, parameter-load-time cost).
    """
    weights, biases = params["weights"], params["biases"]
    n_layers = len(weights)
    n_hidden = n_layers - 1
    N, d0 = b_z.shape
    dims = [d0] + [int(w.shape[1]) for w in weights]

    # --- pack the many tiny parameters into two operands (fewer DMA descriptors) -------
    # f32 column slab: hidden-layer biases, then the final layer's weight column and bias.
    b_offsets, off = [], 0
    for li in range(n_hidden):
        b_offsets.append(off)
        off = _round_up(off + dims[li + 1], 8)
    wl_offset = off
    off = _round_up(off + dims[-2], 8)
    bl_offset = off
    p_pack = np.zeros((_round_up(off + 1, 8), 1), np.float32)
    for li in range(n_hidden):
        p_pack[b_offsets[li]:b_offsets[li] + dims[li + 1], :] = \
            np.asarray(biases[li], np.float32).T
    p_pack[wl_offset:wl_offset + dims[-2], :] = np.asarray(weights[-1], np.float32)
    p_pack[bl_offset:bl_offset + 1, :] = np.asarray(biases[-1], np.float32)

    dout_row = jnp.reshape(out_deg_inv_sqrt, (1, N)).astype(jnp.float32)
    din_row = jnp.reshape(in_deg_inv_sqrt, (1, N)).astype(jnp.float32)

    args = [b_adj_weighted.astype(jnp.float32), dout_row, din_row]
    w_offsets = []
    if n_hidden >= 1:
        args.append(b_z.astype(jnp.float32))              # z in its natural (N, D0) layout
        # bf16 slab of the hidden-layer W.T blocks (rows padded to the bf16 sublane tile).
        woff = 0
        for li in range(n_hidden):
            w_offsets.append(woff)
            woff = _round_up(woff + dims[li + 1], 16)
        max_din = max(dims[li] for li in range(n_hidden))
        w_pack = np.zeros((max(woff, 16), max_din), np.float32)
        for li in range(n_hidden):
            w_pack[w_offsets[li]:w_offsets[li] + dims[li + 1], 0:dims[li]] = \
                np.asarray(weights[li], np.float32).T
        args.append(jnp.asarray(w_pack, jnp.bfloat16))
    else:
        # decoder_l == 1 corner case: keep z in f32 for the single (final) layer.
        args.append(jnp.transpose(b_z).astype(jnp.float32))
    args.append(jnp.asarray(p_pack))

    # --- advisory cost estimate + explicit VMEM budget ----------------------------------
    flops = 0
    for li in range(n_hidden):
        flops += 2 * dims[li + 1] * dims[li] * N + 2 * dims[li + 1] * N * N
    flops += 2 * dims[-2] * N + 2 * N * N
    transcend = b_size * max(n_units_out - nonlin_split, 0)      # sigmoid lanes only
    operand_bytes = sum(int(a.size) * a.dtype.itemsize for a in args) + N * 4
    # in-kernel residents: bf16 copy of A + a handful of (D, N) f32 activation slabs.
    scratch_bytes = N * N * 2 + 8 * max(dims) * max(N, 128) * 4
    vmem_limit = int(min(56 * 2 ** 20,                     # stay under v7x's 64 MiB physical
                         max(16 * 2 ** 20, 2 * (operand_bytes + scratch_bytes))))

    kernel = make_fused_decoder_kernel(dims, n_units_out, nonlin_split,
                                       w_offsets, b_offsets, wl_offset, bl_offset)
    vmem = pltpu.MemorySpace.VMEM
    # No grid + memory_space-only BlockSpecs: single invocation, every operand resident in
    # VMEM exactly once (no pipeline double-buffering of the (N, N) adjacency).
    out_row = pl.pallas_call(
        kernel,
        out_shape=jax.ShapeDtypeStruct((1, N), jnp.float32),
        in_specs=[pl.BlockSpec(memory_space=vmem) for _ in args],
        out_specs=pl.BlockSpec(memory_space=vmem),
        compiler_params=pltpu.CompilerParams(vmem_limit_bytes=vmem_limit),
        cost_estimate=pl.CostEstimate(flops=flops, transcendentals=transcend,
                                      bytes_accessed=operand_bytes),
    )(*args)

    # x_hat = z.reshape(b_size, -1): node n -> (n // n_units_out, n % n_units_out), which is
    # exactly what reshaping the lane-ordered (1, N) row gives.
    return out_row.reshape(b_size, n_units_out)


# ----------------------------- reference (JAX) ------------------------------


def reference_forward(params, b_z, a, dout, din, b_size, nonlin_split):
    z = b_z
    n_layers = len(params["weights"])
    for li in range(n_layers):
        h = (z * dout) @ params["weights"][li]
        h = a @ h
        h = h * din + params["biases"][li]
        if li != n_layers - 1:
            h = jnp.maximum(h, 0.0)
        z = h
    x = z.reshape(b_size, -1)
    col = jnp.arange(x.shape[1])[None, :]
    return jnp.where(col < nonlin_split, jnp.maximum(x, 0.0), jax.nn.sigmoid(x))


# ----------------------------------- main -----------------------------------

if __name__ == "__main__":
    # Module hyper-parameters (small, consistent with the forward pass).
    b_size = 2
    n_units_out = 8           # features per sample -> N = b_size * n_units_out graph nodes
    N = b_size * n_units_out  # 16 nodes
    decoder_dim = 32
    decoder_l = 2             # 32 -> 16 (relu) -> 1
    nonlin_split = 4          # decoder_nonlin_out = [('relu', 4), ('sigmoid', 4)]

    key = jax.random.PRNGKey(0)
    k_z, k_adj, k_ew, k_w1, k_w2 = jax.random.split(key, 5)

    # Node features.
    b_z = jax.random.normal(k_z, (N, decoder_dim), dtype=jnp.float32)

    # Deterministic homogeneous graph: random binary adjacency + self loops.
    adj_bin = (jax.random.uniform(k_adj, (N, N)) < 0.3).astype(jnp.float32)
    adj_bin = jnp.maximum(adj_bin, jnp.eye(N, dtype=jnp.float32))
    edge_w = jax.random.uniform(k_ew, (N, N), minval=0.5, maxval=1.5, dtype=jnp.float32)
    a_weighted = adj_bin * edge_w                     # A[dst, src] = edge weight

    # GraphConv norm='both' uses edge-count degrees, clamped at 1 (DGL behavior).
    in_deg = jnp.maximum(adj_bin.sum(axis=1), 1.0)    # incoming edges per dst (row sum)
    out_deg = jnp.maximum(adj_bin.sum(axis=0), 1.0)   # outgoing edges per src (col sum)
    din_inv_sqrt = (in_deg ** -0.5).reshape(N, 1).astype(jnp.float32)
    dout_inv_sqrt = (out_deg ** -0.5).reshape(N, 1).astype(jnp.float32)

    # Deterministic parameters (GraphConv: weight (Din, Dout), small nonzero biases).
    dims = [decoder_dim, decoder_dim // 2, 1]         # 32 -> 16 -> 1
    wkeys = [k_w1, k_w2]
    weights, biases = [], []
    for li in range(decoder_l):
        din_, dout_ = dims[li], dims[li + 1]
        scale = (6.0 / (din_ + dout_)) ** 0.5
        w = jax.random.uniform(wkeys[li], (din_, dout_), minval=-scale, maxval=scale,
                               dtype=jnp.float32)
        b = jnp.full((1, dout_), 0.01 * (li + 1), dtype=jnp.float32)
        weights.append(w)
        biases.append(b)
    params = {"weights": weights, "biases": biases}

    out = graph_decoder_homo_forward(params, b_z, a_weighted, dout_inv_sqrt,
                                     din_inv_sqrt, b_size, n_units_out, nonlin_split)
    out = jax.block_until_ready(out)

    ref = reference_forward(params, b_z, a_weighted, dout_inv_sqrt, din_inv_sqrt,
                            b_size, nonlin_split)
    assert out.shape == (b_size, n_units_out)
    # bf16 hidden-layer MXU operands (f32 accumulation, f32 final aggregation) -> relaxed
    # tolerance vs. the all-f32 reference.
    assert jnp.allclose(out, ref, atol=5e-2, rtol=5e-2), "mismatch vs JAX reference"

    print("KERNEL_OK")
</pallas_src>

<mosaic_0001>
module attributes {stable_mosaic.version = 11 : i64} {
  func.func @kernel(%arg0: memref<16x16xf32, #tpu.memory_space<vmem>>, %arg1: memref<1x16xf32, #tpu.memory_space<vmem>>, %arg2: memref<1x16xf32, #tpu.memory_space<vmem>>, %arg3: memref<16x32xf32, #tpu.memory_space<vmem>>, %arg4: memref<16x32xbf16, #tpu.memory_space<vmem>>, %arg5: memref<40x1xf32, #tpu.memory_space<vmem>>, %arg6: memref<1x16xf32, #tpu.memory_space<vmem>>) attributes {dimension_semantics = [], scalar_prefetch = 0 : i64, scratch_operands = 0 : i64, tpu.core_type = #tpu.core_type<tc>} {
    %c0 = arith.constant 0 : index
    %c0_0 = arith.constant 0 : index
    %0 = vector.load %arg1[%c0, %c0_0] : memref<1x16xf32, #tpu.memory_space<vmem>>, vector<1x16xf32>
    %c0_1 = arith.constant 0 : index
    %c0_2 = arith.constant 0 : index
    %1 = vector.load %arg2[%c0_1, %c0_2] : memref<1x16xf32, #tpu.memory_space<vmem>>, vector<1x16xf32>
    %c0_3 = arith.constant 0 : index
    %c0_4 = arith.constant 0 : index
    %2 = vector.load %arg0[%c0_3, %c0_4] : memref<16x16xf32, #tpu.memory_space<vmem>>, vector<16x16xf32>
    %3 = arith.truncf %2 : vector<16x16xf32> to vector<16x16xbf16>
    %c0_5 = arith.constant 0 : index
    %c0_6 = arith.constant 0 : index
    %4 = vector.load %arg3[%c0_5, %c0_6] : memref<16x32xf32, #tpu.memory_space<vmem>>, vector<16x32xf32>
    %5 = arith.truncf %4 : vector<16x32xf32> to vector<16x32xbf16>
    %c0_7 = arith.constant 0 : index
    %c0_8 = arith.constant 0 : index
    %6 = vector.load %arg4[%c0_7, %c0_8] : memref<16x32xbf16, #tpu.memory_space<vmem>>, vector<16x32xbf16>
    %c0_9 = arith.constant 0 : index
    %c0_10 = arith.constant 0 : index
    %7 = vector.load %arg5[%c0_9, %c0_10] : memref<40x1xf32, #tpu.memory_space<vmem>>, vector<16x1xf32>
    %cst = arith.constant dense<0.000000e+00> : vector<16x16xf32>
    %8 = tpu.matmul %6, %5, %cst {dimension_numbers = #tpu.dot_dimension_numbers<[1], [1], [0], [0], [0, 0, 1, 0], [], []>} : vector<16x32xbf16>, vector<16x32xbf16>, vector<16x16xf32> -> vector<16x16xf32>
    %9 = vector.broadcast %0 : vector<1x16xf32> to vector<16x16xf32>
    %10 = arith.mulf %8, %9 : vector<16x16xf32>
    %11 = arith.truncf %10 : vector<16x16xf32> to vector<16x16xbf16>
    %cst_11 = arith.constant dense<0.000000e+00> : vector<16x16xf32>
    %12 = tpu.matmul %11, %3, %cst_11 {dimension_numbers = #tpu.dot_dimension_numbers<[1], [1], [0], [0], [0, 0, 1, 0], [], []>} : vector<16x16xbf16>, vector<16x16xbf16>, vector<16x16xf32> -> vector<16x16xf32>
    %13 = vector.broadcast %1 : vector<1x16xf32> to vector<16x16xf32>
    %14 = arith.mulf %12, %13 : vector<16x16xf32>
    %15 = vector.broadcast %7 : vector<16x1xf32> to vector<16x16xf32>
    %16 = arith.addf %14, %15 : vector<16x16xf32>
    %cst_12 = arith.constant 0.000000e+00 : f32
    %17 = vector.broadcast %cst_12 : f32 to vector<16x16xf32>
    %18 = arith.maximumf %16, %17 : vector<16x16xf32>
    %c16 = arith.constant 16 : index
    %c0_13 = arith.constant 0 : index
    %19 = vector.load %arg5[%c16, %c0_13] : memref<40x1xf32, #tpu.memory_space<vmem>>, vector<16x1xf32>
    %c32 = arith.constant 32 : index
    %c0_14 = arith.constant 0 : index
    %20 = vector.load %arg5[%c32, %c0_14] : memref<40x1xf32, #tpu.memory_space<vmem>>, vector<1x1xf32>
    %21 = vector.broadcast %19 : vector<16x1xf32> to vector<16x16xf32>
    %22 = arith.mulf %18, %21 : vector<16x16xf32>
    %cst_15 = arith.constant dense<0.000000e+00> : vector<16xf32>
    %23 = vector.multi_reduction <add>, %22, %cst_15 [0] : vector<16x16xf32> to vector<16xf32>
    %24 = vector.shape_cast %23 : vector<16xf32> to vector<1x16xf32>
    %25 = arith.mulf %24, %0 : vector<1x16xf32>
    %c0_16 = arith.constant 0 : index
    %c0_17 = arith.constant 0 : index
    %26 = vector.load %arg0[%c0_16, %c0_17] : memref<16x16xf32, #tpu.memory_space<vmem>>, vector<16x16xf32>
    %cst_18 = arith.constant dense<0.000000e+00> : vector<1x16xf32>
    %27 = tpu.matmul %25, %26, %cst_18 {dimension_numbers = #tpu.dot_dimension_numbers<[1], [1], [0], [0], [0, 0, 1, 0], [], []>} : vector<1x16xf32>, vector<16x16xf32>, vector<1x16xf32> -> vector<1x16xf32>
    %28 = arith.mulf %27, %1 : vector<1x16xf32>
    %29 = vector.broadcast %20 : vector<1x1xf32> to vector<1x16xf32>
    %30 = arith.addf %28, %29 : vector<1x16xf32>
    %31 = tpu.iota {dimensions = array<i32: 1>} : vector<1x16xi32>
    %c8_i32 = arith.constant 8 : i32
    %c0_i32 = arith.constant 0 : i32
    %32 = arith.cmpi eq, %c8_i32, %c0_i32 : i32
    %c1_i32 = arith.constant 1 : i32
    %33 = arith.select %32, %c1_i32, %c8_i32 : i32
    %34 = vector.broadcast %33 : i32 to vector<1x16xi32>
    %35 = arith.remsi %31, %34 : vector<1x16xi32>
    %c0_i32_19 = arith.constant 0 : i32
    %36 = vector.broadcast %c0_i32_19 : i32 to vector<1x16xi32>
    %37 = arith.cmpi ne, %35, %36 : vector<1x16xi32>
    %c0_i32_20 = arith.constant 0 : i32
    %38 = vector.broadcast %c0_i32_20 : i32 to vector<1x16xi32>
    %39 = arith.cmpi slt, %35, %38 : vector<1x16xi32>
    %c0_i32_21 = arith.constant 0 : i32
    %40 = arith.cmpi slt, %33, %c0_i32_21 : i32
    %41 = vector.broadcast %40 : i1 to vector<1x16xi1>
    %42 = vector.broadcast %41 : vector<1x16xi1> to vector<1x16xi1>
    %43 = arith.xori %39, %42 : vector<1x16xi1>
    %44 = arith.andi %43, %37 : vector<1x16xi1>
    %45 = vector.broadcast %33 : i32 to vector<1x16xi32>
    %46 = arith.addi %35, %45 : vector<1x16xi32>
    %47 = arith.select %44, %46, %35 : vector<1x16xi1>, vector<1x16xi32>
    %c4_i32 = arith.constant 4 : i32
    %48 = vector.broadcast %c4_i32 : i32 to vector<1x16xi32>
    %49 = arith.cmpi slt, %47, %48 : vector<1x16xi32>
    %cst_22 = arith.constant 0.000000e+00 : f32
    %50 = vector.broadcast %cst_22 : f32 to vector<1x16xf32>
    %51 = arith.maximumf %30, %50 : vector<1x16xf32>
    %52 = arith.negf %30 : vector<1x16xf32>
    %53 = math.exp %52 : vector<1x16xf32>
    %cst_23 = arith.constant 1.000000e+00 : f32
    %54 = vector.broadcast %cst_23 : f32 to vector<1x16xf32>
    %55 = arith.addf %54, %53 : vector<1x16xf32>
    %56 = arith.divf %54, %55 : vector<1x16xf32>
    %57 = arith.select %49, %51, %56 : vector<1x16xi1>, vector<1x16xf32>
    %c0_24 = arith.constant 0 : index
    %c0_25 = arith.constant 0 : index
    %58 = vector.load %arg6[%c0_24, %c0_25] : memref<1x16xf32, #tpu.memory_space<vmem>>, vector<1x16xf32>
    tpu.vector_store %arg6[%c0_24, %c0_25], %57 {strides = array<i32>} : memref<1x16xf32, #tpu.memory_space<vmem>>, vector<1x16xf32>,
    return
  }
}

</mosaic_0001>

<bundles_post_ra>
// kernel: tpu_custom_call.1
= control target key start
LH: loop header
LB: loop body
LE: loop exit
PB: predicated region body
PF: predicated region fallthrough
CT: control target
= control target key end

     0   :  { %vm42_vm0 = vcmask 261120   ;;  %v385_v2 = vmov 0.0   ;;  %vm386_vm1 = vmmov 0   ;;  %s470_s0 = inlined_call_operand.vmem [shape: f32[16,16], index: 0, kind: input, shape index: {}]   ;;  %s471_s1 = inlined_call_operand.vmem [shape: f32[1,16], index: 1, kind: input, shape index: {}]   ;;  %s472_s2 = inlined_call_operand.vmem [shape: f32[1,16], index: 2, kind: input, shape index: {}]   ;;  %s473_s3 = inlined_call_operand.vmem [shape: f32[16,32], index: 3, kind: input, shape index: {}]   ;;  %s474_s4 = inlined_call_operand.vmem [shape: bf16[16,32], index: 4, kind: input, shape index: {}]   ;;  %s475_s5 = inlined_call_operand.vmem [shape: f32[40,1], index: 5, kind: input, shape index: {}]   ;;  %s476_s6 = inlined_call_operand.hbm [shape: f32[1,16], index: 6, kind: output, shape index: {}]  }
   0x1   :  { %v30_v0 = vld [vmem:[%s473_s3] sm:$0xff]  ;;  %v31_v1 = vld [vmem:[%s473_s3 + $0x8] sm:$0xff]  ;;  %333 = vmatprep.subr.bf16.mxu0 %v385_v2  ;;  %335 = vmatprep.mubr.msk.bf16.mxu0 %vm386_vm1, %v385_v2 }
   0x2   :  { %v32_v3 = vpack.c.bf16 %v31_v1, %v30_v0  ;;  %339 = vmatprep.subr.bf16.mxu1 %v385_v2  ;;  %341 = vmatprep.mubr.msk.bf16.mxu1 %vm386_vm1, %v385_v2 }
   0x3   :  { %11 = vsyncpa [#allocation3], 0  ;;  %v358_v5 = vld [vmem:[%s474_s4] sm:$0xff]   ;;  %v28_v7 = vld [vmem:[%s470_s0 + $0x8] sm:$0xff]  ;;  %vm99_vm2 = vcmask 130048   ;;  %v387_v12 = vmov 0   ;;  %v91_v16 = vlaneseq }
   0x4   :  { %v47_v4 = vsel %vm42_vm0, %v32_v3, 0  ;;  %v27_v6 = vld [vmem:[%s470_s0] sm:$0xff]  ;;  %v169_v11 = vld [vmem:[%s475_s5 + $0x10] sm:$0xff]  ;;  %356 = vset.pattern.permute.xlu0 %v387_v12  ;;  %357 = vset.pattern.permute.xlu1 %v387_v12  ;;  %v36_v13 = vld [vmem:[%s475_s5 + $0x8] sm:$0xff]  ;;  %vm303_vm4 = vcmask 122880  }
   0x5   :  { %334 = vmatpush3.bf16.xpose.msra.mxu0 %v47_v4  ;;  %v29_v8 = vpack.c.bf16 %v28_v7, %v27_v6  ;;  %v35_v10 = vld [vmem:[%s475_s5] sm:$0xff]  ;;  %174 = vperm.xlu1 %357, %v169_v11   ;;  %v170_v14 = vld [vmem:[%s475_s5 + $0x18] sm:$0xff]  ;;  %v92_v17 = vshrl.u32 %v91_v16, 7  ;;  %v281_v0 = vand.u32 127, %v91_v16 }
   0x6   :  { %345 = vmatprep.subr.mxu0 %v385_v2  ;;  %157 = vperm.xlu0 %356, %v35_v10   ;;  %v171_v15 = vld [vmem:[%s475_s5 + $0x20] sm:$0x1] }
   0x7   :  { %v104_v9 = vsel %vm99_vm2, %v29_v8, 0  ;;  %v93_v18 = vsub.s32 0, %v92_v17  ;;  %v25_v19 = vld [vmem:[%s471_s1] sm:$0x1]  ;;  %v286_v1 = vand.u32 7, %v281_v0  ;;  %s388_s1 = smov [#allocation2]  }
   0x8   :  { %340 = vmatpush3.bf16.xpose.msra.mxu1 %v104_v9  ;;  %v26_v28 = vld [vmem:[%s472_s2] sm:$0x1]  ;;  %s311_s2 = sshll.u32 %s388_s1, 4  ;;  %s312_s2 = int_to_ptr.vmem [resolvable:$true] %s311_s2 }
   0x9   :  { %179 = vperm.xlu1 %357, %v170_v14   ;;  %v94_v21 = vrot.slane %v25_v19, %v93_v18  ;;  %v151_v29 = vrot.slane %v26_v28, %v93_v18  ;;  %vm294_vm3 = vcmp.lt.s32.totalorder %v286_v1, 4  ;;  %s363_s17 = scalar_lea.vmem %s312_s2, 16  ;;  %s367_s18 = scalar_lea.vmem %s312_s2, 32 }
   0xa   :  { %162 = vperm.xlu0 %356, %v36_v13   ;;  %p364_p0 = scmp.ne.s32.totalorder %s312_s2, %s363_s17  ;;  %p368_p1 = scmp.lt.s32.totalorder %s312_s2, %s312_s2 }
   0xb   :  { %p369_p2 = scmp.lt.s32.totalorder %s367_s18, %s363_s17 }
   0xc   :  { %336 = vmatmul.mubr.msk.bf16.vlgmr.msra.gmra.mxu0 %vm42_vm0, %v358_v5 }
   0xd   :  { %349 = vmatprep.mubr.msk.f32.mxu0 %vm386_vm1, %v385_v2  ;;  %346 = vmatpush3.xpose.msk.msra.mxu0 %vm99_vm2, %v28_v7  ;;  %p370_p3 = por %p369_p2, %p368_p1 }
   0xe   :  { %347 = vmatprep.subr.mxu0 %v385_v2  ;;  %276 = vperm.xlu0 %356, %v171_v15  }
   0xf   :  { %p371_p4 = pnand %p370_p3, %p364_p0 }
  0x11   :  { %348 = vmatpush3.xpose.msk.msra.mxu0 %vm99_vm2, %v27_v6 }
  0x80   :  { %v175_v35 = vpop.permute.xlu1 %174 }
  0x81   :  { %v158_v30 = vpop.permute.xlu0 %157 }
  0x84   :  { %v180_v44 = vpop.permute.xlu1 %179 }
  0x85   :  { %v163_v39 = vpop.permute.xlu0 %162 }
  0x89   :  { %v277_v58 = vpop.permute.xlu0 %276 }
  0xcc   :  { %v83_v20 = vpop.f32.mrf.mxu0 }
  0xcd   :  { %v96_v24 = vmul.f32 %v94_v21, %v83_v20 }
  0xce   :  { %v337_v22 = vpop.f32.mrf.mxu0 }
  0xd0   :  { %v86_v23 = vpop.f32.mrf.mxu0 }
  0xd1   :  { %v97_v25 = vmul.f32 %v94_v21, %v86_v23 }
  0xd2   :  { %v338_v26 = vpop.f32.mrf.mxu0 }
  0xd3   :  { %v98_v27 = vpack.c.bf16 %v97_v25, %v96_v24 }
  0xd5   :  { %342 = vmatmul.mubr.msk.bf16.vlgmr.msra.gmra.mxu1 %vm99_vm2, %v98_v27 }
 0x195   :  { %v140_v31 = vpop.f32.mrf.mxu1 }
 0x196   :  { %v153_v32 = vmul.f32 %v151_v29, %v140_v31 }
 0x197   :  { %v343_v33 = vpop.f32.mrf.mxu1 }
 0x198   :  { %v165_v34 = vadd.f32 %v158_v30, %v153_v32 }
 0x199   :  { %v143_v36 = vpop.f32.mrf.mxu1 }
 0x19a   :  { %v167_v37 = vmax.f32 %v165_v34, 0.0  ;;  %v154_v38 = vmul.f32 %v151_v29, %v143_v36 }
 0x19b   :  { %v344_v40 = vpop.f32.mrf.mxu1 }
 0x19c   :  { %v166_v41 = vadd.f32 %v163_v39, %v154_v38  ;;  %v182_v42 = vmul.f32 %v175_v35, %v167_v37 }
 0x19e   :  { %v168_v43 = vmax.f32 %v166_v41, 0.0  ;;  %v184_v46 = vsel %vm99_vm2, %v182_v42, 0.0 }
 0x1a0   :  { %v183_v45 = vmul.f32 %v180_v44, %v168_v43 }
 0x1a2   :  { %v185_v47 = vsel %vm99_vm2, %v183_v45, 0.0 }
 0x1a3   :  { %v186_v48 = vadd.f32 %v185_v47, %v184_v46 }
 0x1a5   :  { %v187_v49 = vrot.slane %v186_v48, 4 }
 0x1a7   :  { %v188_v50 = vadd.f32 %v187_v49, %v186_v48 }
 0x1a9   :  { %v189_v51 = vrot.slane %v188_v50, 2 }
 0x1ab   :  { %v190_v52 = vadd.f32 %v189_v51, %v188_v50 }
 0x1ad   :  { %v191_v53 = vrot.slane %v190_v52, 1 }
 0x1af   :  { %v192_v54 = vadd.f32 %v191_v53, %v190_v52 }
 0x1b1   :  { %v193_v55 = vmul.f32 %v192_v54, %v25_v19 }
 0x1b3   :  { %350 = vmatmul.mubr.msk.f32.vlgmr.msra.gmra.mxu0 %vm99_vm2, %v193_v55 }
 0x273   :  { %v269_v56 = vpop.f32.mrf.mxu0 }
 0x274   :  { %v273_v57 = vmul.f32 %v269_v56, %v26_v28 }
 0x275   :  { %v351_v59 = vpop.f32.mrf.mxu0 }
 0x276   :  { %v279_v60 = vadd.f32 %v277_v58, %v273_v57 }
 0x278   :  { %v325_v61 = vmul.f32 -1.442695, %v279_v60  ;;  %v295_v2 = vmax.f32 %v279_v60, 0.0 }
 0x27a   :  { %359 = vpow2.f32 %v325_v61 }
 0x287   :  { %v360_v62 = vpop.eup %359 }
 0x288   :  { %v299_v63 = vadd.f32 1.0, %v360_v62 }
 0x28a   :  { %361 = vrcp.f32 %v299_v63 }
 0x297   :  { %v362_v3 = vpop.eup %361 }
 0x298   :  { %v302_v4 = vsel %vm294_vm3, %v295_v2, %v362_v3 }
 0x299   :  { %304 = vst.msk [vmem:[#allocation2] sm:$0x1] %vm303_vm4, %v302_v4 }
 0x29a   :  { %374 = shalt.err (!%p371_p4)
}
 0x29b   :  { %314 = dma.vmem_to_hbm [thread:$0]  %s312_s2, 16, %s476_s6, [#allocation3]  }
 0x29c   :  { %383 = dma.done.wait [#allocation3], 16  }
 0x29d   :  { %384 = vsyncadd [#allocation3], 4294967280 }
 0x29e   :  { %318 = vsyncpa [#allocation3], 1 }

</bundles_post_ra>
